<compile_context>
chip_gen: v7x
topology: tpu7x:2x2x1
jax: 0.10.0
libtpu: 0.0.40
codegen_flags: <defaults>
</compile_context>

<pallas_src>
import functools

import jax
import jax.numpy as jnp
from jax.experimental import pallas as pl
from jax.experimental.pallas import tpu as pltpu


_A_CHUNK = 512          # max one-hot contraction width per MXU pass
_HEADROOM = 12 << 20    # VMEM reserved for compiler-internal scratch


def _round_up(x, m):
    return ((x + m - 1) // m) * m


def _vmem_capacity_bytes():
    try:
        cap = getattr(pltpu.get_tpu_info(), "vmem_capacity_bytes", None)
        if cap:
            return int(cap)
    except Exception:
        pass
    return 64 << 20  # conservative (v7x-sized) fallback


def _make_kernel(a_valid, tb, a_chunk):
    def kernel(idx_ref, emb_ref, out_ref):
        # idx_ref : (B_pad, 1) int32  -- full index column, VMEM-resident
        # emb_ref : (A_pad, D_pad)    -- full embedding table, VMEM-resident
        # out_ref : (TB, D_pad)
        a_pad, d_pad = emb_ref.shape
        start = pl.multiple_of(pl.program_id(0) * tb, tb)
        idx = idx_ref[pl.ds(start, tb), :]                    # (TB, 1)
        idx = jnp.clip(idx, 0, a_valid - 1)                   # in-kernel clamp (free)

        dot = functools.partial(
            jnp.dot,
            preferred_element_type=jnp.float32,
            precision=jax.lax.Precision.HIGHEST,              # bit-exact f32 gather
        )

        if a_pad <= a_chunk:
            col = jax.lax.broadcasted_iota(jnp.int32, (tb, a_pad), 1)
            onehot = (idx == col).astype(emb_ref.dtype)
            acc = dot(onehot, emb_ref[...])
        else:
            n_chunks = a_pad // a_chunk
            col = jax.lax.broadcasted_iota(jnp.int32, (tb, a_chunk), 1)

            def body(c, acc):
                off = pl.multiple_of(c * a_chunk, a_chunk)
                onehot = ((idx - off) == col).astype(emb_ref.dtype)
                return acc + dot(onehot, emb_ref[pl.ds(off, a_chunk), :])

            acc = jax.lax.fori_loop(
                0, n_chunks, body,
                jnp.zeros((tb, d_pad), jnp.float32),
                unroll=bool(n_chunks <= 8),
            )

        out_ref[...] = acc.astype(out_ref.dtype)

    return kernel


def embed_action(idx, embedding, *, block_rows=512):
    """idx: (B,) integer action ids; embedding: (A, D) table. Returns (B, D)."""
    (B,) = idx.shape
    A, D = embedding.shape
    esize = jnp.dtype(embedding.dtype).itemsize

    # ---- layout padding ------------------------------------------------------
    D_pad = _round_up(D, 128)                        # lane-dense, unmasked stores
    a_chunk = min(_A_CHUNK, _round_up(A, 8))
    A_pad = _round_up(A, a_chunk) if A > a_chunk else A
    emb = embedding
    if (A_pad, D_pad) != (A, D):
        emb = jnp.pad(emb, ((0, A_pad - A), (0, D_pad - D)))

    # ---- row tiling ----------------------------------------------------------
    # Big tiles for the HBM-write roofline, but >= 2 grid steps when possible
    # so a v7x chip can shard the "parallel" axis across both TensorCores.
    if B > 8:
        TB = min(block_rows, _round_up(pl.cdiv(B, 2), 8))
    else:
        TB = _round_up(max(B, 1), 8)
    B_pad = pl.cdiv(B, TB) * TB

    # Padded index column (pad rows gather row 0 and are sliced off below);
    # the range clamp happens inside the kernel.
    idx2 = jnp.pad(idx.astype(jnp.int32)[:, None], ((0, B_pad - B), (0, 0)))

    # ---- generation-aware VMEM budget ---------------------------------------
    vmem_need = (
        A_pad * D_pad * esize            # resident table (single-buffered)
        + B_pad * 4                      # resident index column
        + 2 * TB * D_pad * esize         # double-buffered output tile
        + TB * min(A_pad, a_chunk) * 4   # one-hot intermediate
        + TB * D_pad * 4                 # f32 accumulator
        + (2 << 20)                      # slack
    )
    budget = _vmem_capacity_bytes() - _HEADROOM
    if vmem_need > budget:
        # TODO(synk): manual DMA-gather fallback for tables that exceed VMEM.
        raise ValueError(
            f"embedding table too large for the resident-VMEM fast path "
            f"(need ~{vmem_need >> 20} MiB, budget {budget >> 20} MiB)"
        )

    kernel = _make_kernel(A, TB, a_chunk)
    cost = pl.CostEstimate(
        flops=2 * B_pad * A_pad * D_pad,
        transcendentals=0,
        bytes_accessed=A_pad * D_pad * esize + B_pad * D_pad * esize + B_pad * 4,
    )
    params = pltpu.CompilerParams(
        dimension_semantics=("parallel",),
        vmem_limit_bytes=int(min(budget, max(2 * vmem_need, 64 << 20))),
    )

    def build(single_buffer):
        if single_buffer:
            idx_spec = pl.BlockSpec((B_pad, 1), lambda i: (0, 0),
                                    pipeline_mode=pl.Buffered(1))
            emb_spec = pl.BlockSpec((A_pad, D_pad), lambda i: (0, 0),
                                    pipeline_mode=pl.Buffered(1))
        else:
            idx_spec = pl.BlockSpec((B_pad, 1), lambda i: (0, 0))
            emb_spec = pl.BlockSpec((A_pad, D_pad), lambda i: (0, 0))
        return pl.pallas_call(
            kernel,
            out_shape=jax.ShapeDtypeStruct((B_pad, D_pad), embedding.dtype),
            grid=(B_pad // TB,),
            in_specs=[idx_spec, emb_spec],
            out_specs=pl.BlockSpec((TB, D_pad), lambda i: (i, 0)),
            compiler_params=params,
            cost_estimate=cost,
        )

    try:
        out = build(True)(idx2, emb)
    except Exception:
        # Fallback if this jaxlib rejects pipeline_mode=Buffered(1); constant
        # block index still means the blocks are only DMA'd once.
        out = build(False)(idx2, emb)

    out = out[:B]
    if D_pad != D:
        out = out[:, :D]
    return out


def embed_action_module(x, embedding):
    """Full forward: x is the raw (B, K) input; column 0 holds action ids."""
    idx = x[:, 0].astype(jnp.int32)  # matches input[:, 0].to(torch.long)
    return embed_action(idx, embedding)


if __name__ == "__main__":
    num_actions = 16
    latent_dim = 128
    batch = 8

    key = jax.random.PRNGKey(0)
    k_emb, k_idx = jax.random.split(key)

    # Deterministic "randn" parameter, like nn.Parameter(torch.randn(...)).
    action_embedding = jax.random.normal(
        k_emb, (num_actions, latent_dim), dtype=jnp.float32
    )

    # Input mimics the PyTorch module: a float tensor whose first column
    # holds action indices (cast to long in forward).
    raw_idx = jax.random.randint(k_idx, (batch,), 0, num_actions)
    x = jnp.concatenate(
        [raw_idx[:, None].astype(jnp.float32),
         jnp.zeros((batch, 3), dtype=jnp.float32)],
        axis=1,
    )  # shape (B, 4)

    out = embed_action_module(x, action_embedding)
    out = jax.block_until_ready(out)

    # Reference check against a plain JAX gather.
    ref = jnp.take(action_embedding, raw_idx, axis=0)
    assert out.shape == (batch, latent_dim)
    assert jnp.allclose(out, ref), "Pallas gather mismatch vs reference"

    print("KERNEL_OK")
</pallas_src>

<mosaic_0001>
module attributes {stable_mosaic.version = 11 : i64} {
  func.func @kernel(%arg0: i32, %arg1: memref<8x1xi32, #tpu.memory_space<vmem>>, %arg2: memref<16x128xf32, #tpu.memory_space<vmem>>, %arg3: memref<8x128xf32, #tpu.memory_space<vmem>>) attributes {dimension_semantics = [#tpu.dimension_semantics<parallel>], iteration_bounds = array<i64: 1>, scalar_prefetch = 0 : i64, scratch_operands = 0 : i64, tpu.core_type = #tpu.core_type<tc>, window_params = [{pipeline_mode = #tpu.pipeline_mode<synchronous>, transform_indices = @transform_0, window_bounds = array<i64: 8, 1>}, {pipeline_mode = #tpu.pipeline_mode<synchronous>, transform_indices = @transform_1, window_bounds = array<i64: 16, 128>}, {transform_indices = @transform_2, window_bounds = array<i64: 8, 128>}]} {
    %c8_i32 = arith.constant 8 : i32
    %0 = arith.muli %arg0, %c8_i32 : i32
    %1 = tpu.assume_multiple %0, 8 : i32
    %2 = arith.index_cast %1 : i32 to index
    %c0 = arith.constant 0 : index
    %3 = vector.load %arg1[%2, %c0] : memref<8x1xi32, #tpu.memory_space<vmem>>, vector<8x1xi32>
    %c0_i32 = arith.constant 0 : i32
    %c15_i32 = arith.constant 15 : i32
    %4 = vector.broadcast %c0_i32 : i32 to vector<8x1xi32>
    %5 = arith.maxsi %4, %3 : vector<8x1xi32>
    %6 = vector.broadcast %c15_i32 : i32 to vector<8x1xi32>
    %7 = arith.minsi %6, %5 : vector<8x1xi32>
    %8 = tpu.iota {dimensions = array<i32: 1>} : vector<8x16xi32>
    %9 = vector.broadcast %7 : vector<8x1xi32> to vector<8x16xi32>
    %10 = arith.cmpi eq, %9, %8 : vector<8x16xi32>
    %11 = arith.extui %10 : vector<8x16xi1> to vector<8x16xi32>
    %12 = arith.sitofp %11 : vector<8x16xi32> to vector<8x16xf32>
    %c0_0 = arith.constant 0 : index
    %c0_1 = arith.constant 0 : index
    %13 = vector.load %arg2[%c0_0, %c0_1] : memref<16x128xf32, #tpu.memory_space<vmem>>, vector<16x128xf32>
    %cst = arith.constant dense<0.000000e+00> : vector<8x128xf32>
    %14 = tpu.matmul %12, %13, %cst {dimension_numbers = #tpu.dot_dimension_numbers<[1], [0], [0], [1], [0, 0, 1, 1], [], []>, precision = #tpu.contract_precision<fp32>} : vector<8x16xf32>, vector<16x128xf32>, vector<8x128xf32> -> vector<8x128xf32>
    %c0_2 = arith.constant 0 : index
    %c0_3 = arith.constant 0 : index
    %15 = vector.load %arg3[%c0_2, %c0_3] : memref<8x128xf32, #tpu.memory_space<vmem>>, vector<8x128xf32>
    tpu.vector_store %arg3[%c0_2, %c0_3], %14 {strides = array<i32>} : memref<8x128xf32, #tpu.memory_space<vmem>>, vector<8x128xf32>,
    return
  }
  func.func @transform_0(%arg0: i32) -> (i32, i32) {
    %c0_i32 = arith.constant 0 : i32
    %c0_i32_0 = arith.constant 0 : i32
    %c0_i32_1 = arith.constant 0 : i32
    return %c0_i32, %c0_i32_0 : i32, i32
  }
  func.func @transform_1(%arg0: i32) -> (i32, i32) {
    %c0_i32 = arith.constant 0 : i32
    %c0_i32_0 = arith.constant 0 : i32
    %c0_i32_1 = arith.constant 0 : i32
    return %c0_i32, %c0_i32_0 : i32, i32
  }
  func.func @transform_2(%arg0: i32) -> (i32, i32) {
    %c0_i32 = arith.constant 0 : i32
    %c0_i32_0 = arith.constant 0 : i32
    return %arg0, %c0_i32 : i32, i32
  }
}

module attributes {stable_mosaic.version = 11 : i64} {
  func.func @kernel(%arg0: i32, %arg1: memref<8x1xi32, #tpu.memory_space<vmem>>, %arg2: memref<16x128xf32, #tpu.memory_space<vmem>>, %arg3: memref<8x128xf32, #tpu.memory_space<vmem>>) attributes {dimension_semantics = [#tpu.dimension_semantics<parallel>], iteration_bounds = array<i64: 1>, scalar_prefetch = 0 : i64, scratch_operands = 0 : i64, tpu.core_type = #tpu.core_type<tc>, window_params = [{pipeline_mode = #tpu.pipeline_mode<synchronous>, transform_indices = @transform_0, window_bounds = array<i64: 8, 1>}, {pipeline_mode = #tpu.pipeline_mode<synchronous>, transform_indices = @transform_1, window_bounds = array<i64: 16, 128>}, {transform_indices = @transform_2, window_bounds = array<i64: 8, 128>}]} {
    %c8_i32 = arith.constant 8 : i32
    %0 = arith.muli %arg0, %c8_i32 : i32
    %1 = tpu.assume_multiple %0, 8 : i32
    %2 = arith.index_cast %1 : i32 to index
    %c0 = arith.constant 0 : index
    %3 = vector.load %arg1[%2, %c0] : memref<8x1xi32, #tpu.memory_space<vmem>>, vector<8x1xi32>
    %c0_i32 = arith.constant 0 : i32
    %c15_i32 = arith.constant 15 : i32
    %4 = vector.broadcast %c0_i32 : i32 to vector<8x1xi32>
    %5 = arith.maxsi %4, %3 : vector<8x1xi32>
    %6 = vector.broadcast %c15_i32 : i32 to vector<8x1xi32>
    %7 = arith.minsi %6, %5 : vector<8x1xi32>
    %8 = tpu.iota {dimensions = array<i32: 1>} : vector<8x16xi32>
    %9 = vector.broadcast %7 : vector<8x1xi32> to vector<8x16xi32>
    %10 = arith.cmpi eq, %9, %8 : vector<8x16xi32>
    %11 = arith.extui %10 : vector<8x16xi1> to vector<8x16xi32>
    %12 = arith.sitofp %11 : vector<8x16xi32> to vector<8x16xf32>
    %c0_0 = arith.constant 0 : index
    %c0_1 = arith.constant 0 : index
    %13 = vector.load %arg2[%c0_0, %c0_1] : memref<16x128xf32, #tpu.memory_space<vmem>>, vector<16x128xf32>
    %cst = arith.constant dense<0.000000e+00> : vector<8x128xf32>
    %14 = tpu.matmul %12, %13, %cst {dimension_numbers = #tpu.dot_dimension_numbers<[1], [0], [0], [1], [0, 0, 1, 1], [], []>, precision = #tpu.contract_precision<fp32>} : vector<8x16xf32>, vector<16x128xf32>, vector<8x128xf32> -> vector<8x128xf32>
    %c0_2 = arith.constant 0 : index
    %c0_3 = arith.constant 0 : index
    %15 = vector.load %arg3[%c0_2, %c0_3] : memref<8x128xf32, #tpu.memory_space<vmem>>, vector<8x128xf32>
    tpu.vector_store %arg3[%c0_2, %c0_3], %14 {strides = array<i32>} : memref<8x128xf32, #tpu.memory_space<vmem>>, vector<8x128xf32>,
    return
  }
  func.func @transform_0(%arg0: i32) -> (i32, i32) {
    %c0_i32 = arith.constant 0 : i32
    %c0_i32_0 = arith.constant 0 : i32
    %c0_i32_1 = arith.constant 0 : i32
    return %c0_i32, %c0_i32_0 : i32, i32
  }
  func.func @transform_1(%arg0: i32) -> (i32, i32) {
    %c0_i32 = arith.constant 0 : i32
    %c0_i32_0 = arith.constant 0 : i32
    %c0_i32_1 = arith.constant 0 : i32
    return %c0_i32, %c0_i32_0 : i32, i32
  }
  func.func @transform_2(%arg0: i32) -> (i32, i32) {
    %c0_i32 = arith.constant 0 : i32
    %c0_i32_0 = arith.constant 0 : i32
    return %arg0, %c0_i32 : i32, i32
  }
}

</mosaic_0001>

<bundles_post_ra>
// kernel: tpu_custom_call.1
= control target key start
LH: loop header
LB: loop body
LE: loop exit
PB: predicated region body
PF: predicated region fallthrough
CT: control target
= control target key end

     0   :  { %7 = vsyncpa [#allocation3], 0  ;;  %s730_s0 = inlined_call_operand.vmem [shape: s32[8,1], index: 0, kind: input, shape index: {}]   ;;  %s731_s1 = inlined_call_operand.hbm [shape: f32[16,128], index: 1, kind: input, shape index: {}]   ;;  %s732_s2 = inlined_call_operand.hbm [shape: f32[8,128], index: 2, kind: output, shape index: {}]  }
   0x1   :  { %8 = vsyncpa [#allocation4], 0  ;;  %s670_s9 = smov [#allocation2]   ;;  %s622_s13 = scalar_lea.hbm %s731_s1, 256 }
   0x2   :  { %s16_s10 = sshll.u32 %s670_s9, 4  ;;  %p623_p0 = scmp.ne.s32.totalorder %s731_s1, %s622_s13  ;;  %s17_s10 = int_to_ptr.vmem [resolvable:$true] %s16_s10 }
   0x3   :  { %p626_p1 = scmp.lt.u32.totalorder %s622_s13, %s731_s1 }
   0x5   :  { %p628_p2 = pnand %p626_p1, %p623_p0 }
   0x7   :  { %631 = shalt.err (!%p628_p2)
}
   0x8   :  { %s632_s18 = scalar_lea.vmem %s17_s10, 256  ;;  %p637_p4 = scmp.lt.s32.totalorder %s17_s10, %s17_s10 }
   0x9   :  { %p633_p3 = scmp.ne.s32.totalorder %s17_s10, %s632_s18  ;;  %p638_p5 = scmp.lt.s32.totalorder %s632_s18, %s632_s18 }
   0xb   :  { %p639_p6 = por %p638_p5, %p637_p4 }
   0xd   :  { %p640_p7 = pnand %p639_p6, %p633_p3 }
   0xf   :  { %643 = shalt.err (!%p640_p7)
}
  0x10   :  { %s671_s19 = smov 128   ;;  %s672_s20 = smov 8  }
  0x11   :  { %22 = dma.hbm_to_vmem [thread:$0]  %s731_s1, 256, %s17_s10, [#allocation3], %s671_s19, %s671_s19, %s672_s20  }
  0x12   :  { %666 = dma.done.wait [#allocation3], 256  }
  0x13   :  { %667 = vsyncadd [#allocation3], 4294967040  ;;  %v673_v0 = vmov 0   ;;  %v28_v1 = vld [vmem:[%s730_s0] sm:$0xff]  ;;  %v42_v5 = vld [vmem:[#allocation2 + $0x8] sm:$0xff]  ;;  %v674_v9 = vmov 0.0|0.0   ;;  %v33_v22 = vlaneseq }
  0x14   :  { %621 = vset.pattern.permute.xlu0 %v673_v0  ;;  %vm29_vm0 = vcmp.gt.s32.totalorder %v28_v1, 0  ;;  %v41_v4 = vld [vmem:[#allocation2] sm:$0xff]  ;;  %v51_v7 = vand.u32 4294901760, %v42_v5  ;;  %595 = vmatprep.subr.bf16.mxu0 %v674_v9  ;;  %vm675_vm2 = vmmov 0   ;;  %v676_v12 = vmov 0.0   ;;  %s677_s0 = smov [#allocation5]  }
  0x15   :  { %v30_v2 = vsel %vm29_vm0, %v28_v1, 0  ;;  %v48_v6 = vand.u32 4294901760, %v41_v4  ;;  %586 = vmatprep.subr.bf16.mxu1 %v674_v9  ;;  %569 = vmatprep.mubr.msk.f32.mxu0 %vm675_vm2, %v676_v12  ;;  %v34_v23 = vand.u32 127, %v33_v22  ;;  %vm43_vm3 = vcmask 130048   ;;  %s513_s1 = sshll.u32 %s677_s0, 4  ;;  %s514_s1 = int_to_ptr.vmem [resolvable:$true] %s513_s1 }
  0x16   :  { %vm31_vm1 = vcmp.lt.s32.totalorder %v30_v2, 15  ;;  %v133_v11 = vsub.f32 %v42_v5, %v51_v7  ;;  %548 = vmatprep.mubr.msk.f32.mxu1 %vm675_vm2, %v676_v12  ;;  %s644_s25 = scalar_lea.vmem %s514_s1, 128  ;;  %p649_p9 = scmp.lt.s32.totalorder %s514_s1, %s514_s1 }
  0x17   :  { %v32_v3 = vsel %vm31_vm1, %v30_v2, 15  ;;  %v587_v8 = vpack.c.bf16 %v51_v7, %v48_v6  ;;  %v126_v10 = vsub.f32 %v41_v4, %v48_v6  ;;  %p645_p8 = scmp.ne.s32.totalorder %s514_s1, %s644_s25  ;;  %p650_p10 = scmp.lt.s32.totalorder %s644_s25, %s644_s25 }
  0x18   :  { %36 = vperm.xlu0 %621, %v32_v3   ;;  %v134_v14 = vand.u32 4294901760, %v133_v11 }
  0x19   :  { %597 = vmatpush3.bf16.msra.mxu0 %v587_v8  ;;  %588 = vmatpush3.bf16.msra.mxu1 %v587_v8  ;;  %v127_v13 = vand.u32 4294901760, %v126_v10  ;;  %v593_v21 = vpack.c.bf16 %v133_v11, %v126_v10  ;;  %p651_p11 = por %p650_p10, %p649_p9 }
  0x1a   :  { %589 = vmatprep.subr.bf16.mxu1 %v674_v9  ;;  %598 = vmatprep.subr.bf16.mxu0 %v674_v9  ;;  %v135_v16 = vsub.f32 %v133_v11, %v134_v14 }
  0x1b   :  { %v128_v15 = vsub.f32 %v126_v10, %v127_v13  ;;  %v599_v17 = vpack.c.bf16 %v134_v14, %v127_v13  ;;  %p652_p12 = pnand %p651_p11, %p645_p8 }
  0x1c   :  { %v136_v19 = vand.u32 4294901760, %v135_v16 }
  0x1d   :  { %v129_v18 = vand.u32 4294901760, %v128_v15 }
  0x1f   :  { %v590_v20 = vpack.c.bf16 %v136_v19, %v129_v18 }
  0x97   :  { %v37_v24 = vpop.permute.xlu0 %36 }
  0x98   :  { %vm38_vm4 = vcmp.eq.s32.totalorder %v37_v24, %v34_v23 }
  0x99   :  { %v522_v25 = vsel %vm38_vm4, 1.0, %v676_v12 }
  0x9a   :  { %v45_v26 = vsel %vm43_vm3, %v522_v25, 0 }
  0x9b   :  { %v115_v27 = vsub.f32 %v45_v26, %v45_v26 }
  0x9d   :  { %v116_v28 = vand.u32 4294901760, %v115_v27 }
  0x9f   :  { %570 = vmatmul.mubr.f32.vlgmr.msra.gmra.mrb[0].mxu0 %v116_v28  ;;  %v117_v29 = vsub.f32 %v115_v27, %v116_v28 }
  0xa0   :  { %600 = vmatpush3.bf16.msra.mxu0 %v599_v17  ;;  %576 = vmatprep.mubr.msk.f32.mxu0 %vm675_vm2, %v676_v12 }
  0xa1   :  { %v118_v30 = vand.u32 4294901760, %v117_v29  ;;  %601 = vmatprep.subr.bf16.mxu0 %v674_v9 }
  0xa3   :  { %549 = vmatmul.mubr.f32.vlgmr.msra.gmra.mrb[0].mxu1 %v118_v30 }
  0xa4   :  { %591 = vmatpush3.bf16.msra.mxu1 %v590_v20  ;;  %555 = vmatprep.mubr.msk.f32.mxu1 %vm675_vm2, %v676_v12 }
  0xa5   :  { %592 = vmatprep.subr.bf16.mxu1 %v674_v9 }
  0xa7   :  { %577 = vmatmul.mubr.msk.f32.vlgmr.msra.gmra.mrb[0].mxu0 %vm43_vm3, %v522_v25 }
  0xa8   :  { %603 = vmatpush3.bf16.msra.mxu0 %v587_v8  ;;  %583 = vmatprep.mubr.msk.f32.mxu0 %vm675_vm2, %v676_v12 }
  0xab   :  { %556 = vmatmul.mubr.msk.f32.vlgmr.msra.gmra.mrb[0].mxu1 %vm43_vm3, %v522_v25 }
  0xac   :  { %594 = vmatpush3.bf16.msra.mxu1 %v593_v21  ;;  %562 = vmatprep.mubr.msk.f32.mxu1 %vm675_vm2, %v676_v12 }
  0xaf   :  { %584 = vmatmul.mubr.msk.f32.vlgmr.msra.gmra.mrb[0].mxu0 %vm43_vm3, %v522_v25 }
  0xb3   :  { %563 = vmatmul.mubr.f32.vlgmr.msra.gmra.mrb[0].mxu1 %v115_v27 }
 0x182   :  { %v502_v31 = vpop.f32.mrb[0].mxu0 }
 0x183   :  { %v585_v32 = vpop.f32.mrb[1].mxu0 }
 0x186   :  { %v277_v33 = vpop.f32.mrb[0].mxu1 }
 0x187   :  { %v604_v34 = vadd.f32 %v502_v31, %v277_v33  ;;  %v564_v35 = vpop.f32.mrb[1].mxu1 }
 0x189   :  { %506 = vst [vmem:[#allocation5] sm:$0xff] %v604_v34 }
 0x18a   :  { %655 = shalt.err (!%p652_p12)
}
 0x18b   :  { %s656_s28 = scalar_lea.hbm %s732_s2, 128 }
 0x18c   :  { %p657_p13 = scmp.ne.s32.totalorder %s732_s2, %s656_s28  ;;  %p660_p0 = scmp.lt.u32.totalorder %s656_s28, %s732_s2 }
 0x18e   :  { %p662_p1 = pnand %p660_p0, %p657_p13 }
 0x190   :  { %665 = shalt.err (!%p662_p1)
}
 0x191   :  { %516 = dma.vmem_to_hbm [thread:$0]  %s514_s1, 128, %s732_s2, [#allocation4]  }
 0x192   :  { %668 = dma.done.wait [#allocation4], 128  }
 0x193   :  { %669 = vsyncadd [#allocation4], 4294967168 }
 0x194   :  { %520 = vsyncpa [#allocation3], 1 }
 0x195   :  { %521 = vsyncpa [#allocation4], 1 }

// kernel: tpu_custom_call.1
= control target key start
LH: loop header
LB: loop body
LE: loop exit
PB: predicated region body
PF: predicated region fallthrough
CT: control target
= control target key end

     0   :  { %7 = vsyncpa [#allocation3], 0  ;;  %s730_s0 = inlined_call_operand.vmem [shape: s32[8,1], index: 0, kind: input, shape index: {}]   ;;  %s731_s1 = inlined_call_operand.hbm [shape: f32[16,128], index: 1, kind: input, shape index: {}]   ;;  %s732_s2 = inlined_call_operand.hbm [shape: f32[8,128], index: 2, kind: output, shape index: {}]  }
   0x1   :  { %8 = vsyncpa [#allocation4], 0  ;;  %s670_s9 = smov [#allocation2]   ;;  %s622_s13 = scalar_lea.hbm %s731_s1, 256 }
   0x2   :  { %s16_s10 = sshll.u32 %s670_s9, 4  ;;  %p623_p0 = scmp.ne.s32.totalorder %s731_s1, %s622_s13  ;;  %s17_s10 = int_to_ptr.vmem [resolvable:$true] %s16_s10 }
   0x3   :  { %p626_p1 = scmp.lt.u32.totalorder %s622_s13, %s731_s1 }
   0x5   :  { %p628_p2 = pnand %p626_p1, %p623_p0 }
   0x7   :  { %631 = shalt.err (!%p628_p2)
}
   0x8   :  { %s632_s18 = scalar_lea.vmem %s17_s10, 256  ;;  %p637_p4 = scmp.lt.s32.totalorder %s17_s10, %s17_s10 }
   0x9   :  { %p633_p3 = scmp.ne.s32.totalorder %s17_s10, %s632_s18  ;;  %p638_p5 = scmp.lt.s32.totalorder %s632_s18, %s632_s18 }
   0xb   :  { %p639_p6 = por %p638_p5, %p637_p4 }
   0xd   :  { %p640_p7 = pnand %p639_p6, %p633_p3 }
   0xf   :  { %643 = shalt.err (!%p640_p7)
}
  0x10   :  { %s671_s19 = smov 128   ;;  %s672_s20 = smov 8  }
  0x11   :  { %22 = dma.hbm_to_vmem [thread:$0]  %s731_s1, 256, %s17_s10, [#allocation3], %s671_s19, %s671_s19, %s672_s20  }
  0x12   :  { %666 = dma.done.wait [#allocation3], 256  }
  0x13   :  { %667 = vsyncadd [#allocation3], 4294967040  ;;  %v673_v0 = vmov 0   ;;  %v28_v1 = vld [vmem:[%s730_s0] sm:$0xff]  ;;  %v42_v5 = vld [vmem:[#allocation2 + $0x8] sm:$0xff]  ;;  %v674_v9 = vmov 0.0|0.0   ;;  %v33_v22 = vlaneseq }
  0x14   :  { %621 = vset.pattern.permute.xlu0 %v673_v0  ;;  %vm29_vm0 = vcmp.gt.s32.totalorder %v28_v1, 0  ;;  %v41_v4 = vld [vmem:[#allocation2] sm:$0xff]  ;;  %v51_v7 = vand.u32 4294901760, %v42_v5  ;;  %595 = vmatprep.subr.bf16.mxu0 %v674_v9  ;;  %vm675_vm2 = vmmov 0   ;;  %v676_v12 = vmov 0.0   ;;  %s677_s0 = smov [#allocation5]  }
  0x15   :  { %v30_v2 = vsel %vm29_vm0, %v28_v1, 0  ;;  %v48_v6 = vand.u32 4294901760, %v41_v4  ;;  %586 = vmatprep.subr.bf16.mxu1 %v674_v9  ;;  %569 = vmatprep.mubr.msk.f32.mxu0 %vm675_vm2, %v676_v12  ;;  %v34_v23 = vand.u32 127, %v33_v22  ;;  %vm43_vm3 = vcmask 130048   ;;  %s513_s1 = sshll.u32 %s677_s0, 4  ;;  %s514_s1 = int_to_ptr.vmem [resolvable:$true] %s513_s1 }
  0x16   :  { %vm31_vm1 = vcmp.lt.s32.totalorder %v30_v2, 15  ;;  %v133_v11 = vsub.f32 %v42_v5, %v51_v7  ;;  %548 = vmatprep.mubr.msk.f32.mxu1 %vm675_vm2, %v676_v12  ;;  %s644_s25 = scalar_lea.vmem %s514_s1, 128  ;;  %p649_p9 = scmp.lt.s32.totalorder %s514_s1, %s514_s1 }
  0x17   :  { %v32_v3 = vsel %vm31_vm1, %v30_v2, 15  ;;  %v587_v8 = vpack.c.bf16 %v51_v7, %v48_v6  ;;  %v126_v10 = vsub.f32 %v41_v4, %v48_v6  ;;  %p645_p8 = scmp.ne.s32.totalorder %s514_s1, %s644_s25  ;;  %p650_p10 = scmp.lt.s32.totalorder %s644_s25, %s644_s25 }
  0x18   :  { %36 = vperm.xlu0 %621, %v32_v3   ;;  %v134_v14 = vand.u32 4294901760, %v133_v11 }
  0x19   :  { %597 = vmatpush3.bf16.msra.mxu0 %v587_v8  ;;  %588 = vmatpush3.bf16.msra.mxu1 %v587_v8  ;;  %v127_v13 = vand.u32 4294901760, %v126_v10  ;;  %v593_v21 = vpack.c.bf16 %v133_v11, %v126_v10  ;;  %p651_p11 = por %p650_p10, %p649_p9 }
  0x1a   :  { %589 = vmatprep.subr.bf16.mxu1 %v674_v9  ;;  %598 = vmatprep.subr.bf16.mxu0 %v674_v9  ;;  %v135_v16 = vsub.f32 %v133_v11, %v134_v14 }
  0x1b   :  { %v128_v15 = vsub.f32 %v126_v10, %v127_v13  ;;  %v599_v17 = vpack.c.bf16 %v134_v14, %v127_v13  ;;  %p652_p12 = pnand %p651_p11, %p645_p8 }
  0x1c   :  { %v136_v19 = vand.u32 4294901760, %v135_v16 }
  0x1d   :  { %v129_v18 = vand.u32 4294901760, %v128_v15 }
  0x1f   :  { %v590_v20 = vpack.c.bf16 %v136_v19, %v129_v18 }
  0x97   :  { %v37_v24 = vpop.permute.xlu0 %36 }
  0x98   :  { %vm38_vm4 = vcmp.eq.s32.totalorder %v37_v24, %v34_v23 }
  0x99   :  { %v522_v25 = vsel %vm38_vm4, 1.0, %v676_v12 }
  0x9a   :  { %v45_v26 = vsel %vm43_vm3, %v522_v25, 0 }
  0x9b   :  { %v115_v27 = vsub.f32 %v45_v26, %v45_v26 }
  0x9d   :  { %v116_v28 = vand.u32 4294901760, %v115_v27 }
  0x9f   :  { %570 = vmatmul.mubr.f32.vlgmr.msra.gmra.mrb[0].mxu0 %v116_v28  ;;  %v117_v29 = vsub.f32 %v115_v27, %v116_v28 }
  0xa0   :  { %600 = vmatpush3.bf16.msra.mxu0 %v599_v17  ;;  %576 = vmatprep.mubr.msk.f32.mxu0 %vm675_vm2, %v676_v12 }
  0xa1   :  { %v118_v30 = vand.u32 4294901760, %v117_v29  ;;  %601 = vmatprep.subr.bf16.mxu0 %v674_v9 }
  0xa3   :  { %549 = vmatmul.mubr.f32.vlgmr.msra.gmra.mrb[0].mxu1 %v118_v30 }
  0xa4   :  { %591 = vmatpush3.bf16.msra.mxu1 %v590_v20  ;;  %555 = vmatprep.mubr.msk.f32.mxu1 %vm675_vm2, %v676_v12 }
  0xa5   :  { %592 = vmatprep.subr.bf16.mxu1 %v674_v9 }
  0xa7   :  { %577 = vmatmul.mubr.msk.f32.vlgmr.msra.gmra.mrb[0].mxu0 %vm43_vm3, %v522_v25 }
  0xa8   :  { %603 = vmatpush3.bf16.msra.mxu0 %v587_v8  ;;  %583 = vmatprep.mubr.msk.f32.mxu0 %vm675_vm2, %v676_v12 }
  0xab   :  { %556 = vmatmul.mubr.msk.f32.vlgmr.msra.gmra.mrb[0].mxu1 %vm43_vm3, %v522_v25 }
  0xac   :  { %594 = vmatpush3.bf16.msra.mxu1 %v593_v21  ;;  %562 = vmatprep.mubr.msk.f32.mxu1 %vm675_vm2, %v676_v12 }
  0xaf   :  { %584 = vmatmul.mubr.msk.f32.vlgmr.msra.gmra.mrb[0].mxu0 %vm43_vm3, %v522_v25 }
  0xb3   :  { %563 = vmatmul.mubr.f32.vlgmr.msra.gmra.mrb[0].mxu1 %v115_v27 }
 0x182   :  { %v502_v31 = vpop.f32.mrb[0].mxu0 }
 0x183   :  { %v585_v32 = vpop.f32.mrb[1].mxu0 }
 0x186   :  { %v277_v33 = vpop.f32.mrb[0].mxu1 }
 0x187   :  { %v604_v34 = vadd.f32 %v502_v31, %v277_v33  ;;  %v564_v35 = vpop.f32.mrb[1].mxu1 }
 0x189   :  { %506 = vst [vmem:[#allocation5] sm:$0xff] %v604_v34 }
 0x18a   :  { %655 = shalt.err (!%p652_p12)
}
 0x18b   :  { %s656_s28 = scalar_lea.hbm %s732_s2, 128 }
 0x18c   :  { %p657_p13 = scmp.ne.s32.totalorder %s732_s2, %s656_s28  ;;  %p660_p0 = scmp.lt.u32.totalorder %s656_s28, %s732_s2 }
 0x18e   :  { %p662_p1 = pnand %p660_p0, %p657_p13 }
 0x190   :  { %665 = shalt.err (!%p662_p1)
}
 0x191   :  { %516 = dma.vmem_to_hbm [thread:$0]  %s514_s1, 128, %s732_s2, [#allocation4]  }
 0x192   :  { %668 = dma.done.wait [#allocation4], 128  }
 0x193   :  { %669 = vsyncadd [#allocation4], 4294967168 }
 0x194   :  { %520 = vsyncpa [#allocation3], 1 }
 0x195   :  { %521 = vsyncpa [#allocation4], 1 }

</bundles_post_ra>
